<compile_context>
chip_gen: v7x
topology: tpu7x:2x2x1
jax: 0.10.0
libtpu: 0.0.40
codegen_flags: <defaults>
</compile_context>

<pallas_src>
import jax
import jax.numpy as jnp
from jax.experimental import pallas as pl
from jax.experimental.pallas import tpu as pltpu

EPS = 1e-5


def _round_up(x, m):
    return ((x + m - 1) // m) * m


def _sublane_multiple(dtype):
    return {4: 8, 2: 16, 1: 32}.get(jnp.dtype(dtype).itemsize, 8)


def _vmem_budget():
    """(max packed-row tile, scoped-VMEM limit), gen-gated by physical VMEM."""
    try:
        kind = jax.devices()[0].device_kind.lower()
    except Exception:
        kind = ""
    if ("v4" in kind) or ("v5" in kind) or ("v6" in kind):
        # 128 MiB physical VMEM parts: wider tiles + higher scoped limit.
        return 16384, 64 * 1024 * 1024
    # Conservative default, covers v7x (64 MiB physical VMEM):
    # 6 double-buffered f32 tiles of 8192x128 = 24 MiB < 32 MiB scoped.
    return 8192, 32 * 1024 * 1024


def _fold_stats(s, q, g, b, *, rep, feat, inv_n, eps):
    """Fold lane-replicated sums into per-lane scale/shift (pass-2 is one FMA)."""
    s_tot, q_tot = s, q
    for k in range(1, rep):                      # static unroll; XLU rolls
        s_tot = s_tot + pltpu.roll(s, k * feat, axis=1)
        q_tot = q_tot + pltpu.roll(q, k * feat, axis=1)
    mean = s_tot * inv_n
    # One-pass biased variance (E[x^2] - mean^2) in f32; clamp guards against
    # tiny negative values from cancellation when |mean| >> std.
    # TODO(synk): use a shifted/Welford cross-tile merge if inputs are far
    # from zero-mean and tighter accuracy is required.
    var = jnp.maximum(q_tot * inv_n - mean * mean, 0.0)
    inv_std = jax.lax.rsqrt(var + eps)
    scale = g * inv_std
    shift = b - mean * scale
    return scale, shift


# ----------------------- small-N fused kernel (3N traffic) -----------------
def _make_fused_kernel(*, rep, feat, n_true, eps):
    inv_n = 1.0 / float(n_true)

    def kernel(x1_ref, x2_ref, g_ref, b_ref, o_ref):
        x = (x1_ref[...] + x2_ref[...]).astype(jnp.float32)
        s = jnp.sum(x, axis=0, keepdims=True)
        q = jnp.sum(x * x, axis=0, keepdims=True)
        scale, shift = _fold_stats(s, q, g_ref[...], b_ref[...],
                                   rep=rep, feat=feat, inv_n=inv_n, eps=eps)
        o_ref[...] = (x * scale + shift).astype(o_ref.dtype)

    return kernel


# ----------------------- large-N path: stats kernel ------------------------
def _make_stats_kernel(*, rep, feat, n_true, eps, valid_rows, tile_r, ragged):
    inv_n = 1.0 / float(n_true)

    def kernel(x1_ref, x2_ref, g_ref, b_ref, scale_ref, shift_ref,
               sum_sc, sq_sc):
        t = pl.program_id(0)
        nt = pl.num_programs(0)

        @pl.when(t == 0)
        def _init():
            sum_sc[...] = jnp.zeros_like(sum_sc)
            sq_sc[...] = jnp.zeros_like(sq_sc)

        x = (x1_ref[...] + x2_ref[...]).astype(jnp.float32)
        if ragged:
            # Mask packed rows beyond the valid extent (ragged last tile:
            # out-of-bounds block data is undefined and must not contribute).
            row = t * tile_r + jax.lax.broadcasted_iota(jnp.int32, x.shape, 0)
            x = jnp.where(row < valid_rows, x, 0.0)
        sum_sc[...] += jnp.sum(x, axis=0, keepdims=True)
        sq_sc[...] += jnp.sum(x * x, axis=0, keepdims=True)

        @pl.when(t == nt - 1)
        def _finalize():
            scale, shift = _fold_stats(sum_sc[...], sq_sc[...],
                                       g_ref[...], b_ref[...],
                                       rep=rep, feat=feat, inv_n=inv_n,
                                       eps=eps)
            scale_ref[...] = scale
            shift_ref[...] = shift

    return kernel


# ----------------------- large-N path: normalize kernel --------------------
def _normalize_kernel(scale_ref, shift_ref, x1_ref, x2_ref, o_ref):
    x = (x1_ref[...] + x2_ref[...]).astype(jnp.float32)
    o_ref[...] = (x * scale_ref[...] + shift_ref[...]).astype(o_ref.dtype)


# ----------------------- wrapper -------------------------------------------
def add_and_normalize(input1, input2, gamma, beta, *,
                      tile_rows=None, small_path_rows=4096):
    """input1, input2: (B, P, E); gamma, beta: (E,). Returns (B, P, E)."""
    B, P, E = input1.shape
    N = B * P
    dtype = input1.dtype
    itemsize = jnp.dtype(dtype).itemsize
    sub = _sublane_multiple(dtype)
    max_tile, vmem_limit = _vmem_budget()
    if tile_rows is None:
        tile_rows = max_tile

    # ---- lane-dense packing ----------------------------------------------
    if E % 128 == 0:
        rep, lane, e_pad = 1, E, E                       # already lane dense
    elif 128 % E == 0:
        rep, lane, e_pad = 128 // E, 128, E              # pack rep rows/vreg row
    else:
        # TODO(synk): could pack lcm(E,128)/128 rows per vreg row instead of
        # feature padding; padding keeps stores lane-dense at some lane waste.
        e_pad = _round_up(E, 128)
        rep, lane = 1, e_pad

    x1 = input1.reshape(N, E)
    x2 = input2.reshape(N, E)
    g = gamma.astype(jnp.float32)
    b = beta.astype(jnp.float32)
    if e_pad != E:
        fpad = e_pad - E
        x1 = jnp.pad(x1, ((0, 0), (0, fpad)))
        x2 = jnp.pad(x2, ((0, 0), (0, fpad)))
        g = jnp.pad(g, (0, fpad))          # gamma=0 / beta=0 => padded lanes -> 0
        b = jnp.pad(b, (0, fpad))

    # Row padding only if the packing reshape itself needs it (rare).  Zero
    # rows add nothing to the sums and we divide by the true N.
    n_rows = N
    if N % rep != 0:
        rpad = rep - (N % rep)
        x1 = jnp.pad(x1, ((0, rpad), (0, 0)))
        x2 = jnp.pad(x2, ((0, rpad), (0, 0)))
        n_rows = N + rpad

    packed_rows = n_rows // rep
    x1p = x1.reshape(packed_rows, lane)
    x2p = x2.reshape(packed_rows, lane)
    gp = jnp.tile(g.reshape(1, e_pad), (1, rep))
    bp = jnp.tile(b.reshape(1, e_pad), (1, rep))

    common = dict(rep=rep, feat=e_pad, n_true=N, eps=EPS)

    if packed_rows <= small_path_rows:
        # -------- VMEM-resident fused path: read x1/x2 once, write once ----
        kernel = _make_fused_kernel(**common)
        out = pl.pallas_call(
            kernel,
            out_shape=jax.ShapeDtypeStruct((packed_rows, lane), dtype),
            grid_spec=pltpu.PrefetchScalarGridSpec(
                num_scalar_prefetch=0,
                grid=(1,),
                in_specs=[
                    pl.BlockSpec((packed_rows, lane), lambda i: (0, 0)),
                    pl.BlockSpec((packed_rows, lane), lambda i: (0, 0)),
                    pl.BlockSpec((1, lane), lambda i: (0, 0)),
                    pl.BlockSpec((1, lane), lambda i: (0, 0)),
                ],
                out_specs=pl.BlockSpec((packed_rows, lane), lambda i: (0, 0)),
            ),
            compiler_params=pltpu.CompilerParams(
                dimension_semantics=("arbitrary",),
                vmem_limit_bytes=vmem_limit,
            ),
            cost_estimate=pl.CostEstimate(
                flops=int(7 * packed_rows * lane),
                transcendentals=int(lane),
                bytes_accessed=int(3 * packed_rows * lane * itemsize),
            ),
        )(x1p, x2p, gp, bp)
    else:
        # -------- two-call path: sequential stats + parallel normalize -----
        tile_r = min(int(tile_rows), packed_rows)
        tile_r = max(sub, (tile_r // sub) * sub)
        if tile_r > packed_rows:
            tile_r = packed_rows                    # single full block
        num_tiles = -(-packed_rows // tile_r)       # cdiv
        ragged = (num_tiles * tile_r != packed_rows)

        stats_kernel = _make_stats_kernel(**common, valid_rows=packed_rows,
                                          tile_r=tile_r, ragged=ragged)
        scale, shift = pl.pallas_call(
            stats_kernel,
            out_shape=(jax.ShapeDtypeStruct((1, lane), jnp.float32),
                       jax.ShapeDtypeStruct((1, lane), jnp.float32)),
            grid_spec=pltpu.PrefetchScalarGridSpec(
                num_scalar_prefetch=0,
                grid=(num_tiles,),
                in_specs=[
                    pl.BlockSpec((tile_r, lane), lambda t: (t, 0)),
                    pl.BlockSpec((tile_r, lane), lambda t: (t, 0)),
                    pl.BlockSpec((1, lane), lambda t: (0, 0)),
                    pl.BlockSpec((1, lane), lambda t: (0, 0)),
                ],
                out_specs=(pl.BlockSpec((1, lane), lambda t: (0, 0)),
                           pl.BlockSpec((1, lane), lambda t: (0, 0))),
                scratch_shapes=[pltpu.VMEM((1, lane), jnp.float32)] * 2,
            ),
            compiler_params=pltpu.CompilerParams(
                dimension_semantics=("arbitrary",),
                vmem_limit_bytes=vmem_limit,
            ),
            cost_estimate=pl.CostEstimate(
                flops=int(4 * packed_rows * lane),
                transcendentals=int(lane),
                bytes_accessed=int(2 * packed_rows * lane * itemsize),
            ),
        )(x1p, x2p, gp, bp)

        # Normalize pass: row-tile axis is independent -> "parallel" so a
        # 2-TensorCore part (v7x) can shard it.  If profiling shows exposed
        # DMA here, add pipeline_mode=pl.Buffered(3) to the x1/x2 specs.
        out = pl.pallas_call(
            _normalize_kernel,
            out_shape=jax.ShapeDtypeStruct((packed_rows, lane), dtype),
            grid_spec=pltpu.PrefetchScalarGridSpec(
                num_scalar_prefetch=0,
                grid=(num_tiles,),
                in_specs=[
                    pl.BlockSpec((1, lane), lambda t: (0, 0)),      # scale
                    pl.BlockSpec((1, lane), lambda t: (0, 0)),      # shift
                    pl.BlockSpec((tile_r, lane), lambda t: (t, 0)),  # x1
                    pl.BlockSpec((tile_r, lane), lambda t: (t, 0)),  # x2
                ],
                out_specs=pl.BlockSpec((tile_r, lane), lambda t: (t, 0)),
            ),
            compiler_params=pltpu.CompilerParams(
                dimension_semantics=("parallel",),
                vmem_limit_bytes=vmem_limit,
            ),
            cost_estimate=pl.CostEstimate(
                flops=int(3 * packed_rows * lane),
                transcendentals=0,
                bytes_accessed=int(3 * packed_rows * lane * itemsize),
            ),
        )(scale, shift, x1p, x2p)

    out = out.reshape(n_rows, e_pad)[:N, :E]
    return out.reshape(B, P, E)


# ----------------------- reference + tests ---------------------------------
def _reference(input1, input2, gamma, beta):
    x = (input1 + input2).reshape(-1, input1.shape[-1]).astype(jnp.float32)
    mean = jnp.mean(x, axis=0, keepdims=True)
    var = jnp.mean((x - mean) ** 2, axis=0, keepdims=True)
    y = (x - mean) / jnp.sqrt(var + EPS) * gamma + beta
    return y.reshape(input1.shape).astype(input1.dtype)


def _run_case(B, P, E, seed, **kwargs):
    key = jax.random.PRNGKey(seed)
    k1, k2 = jax.random.split(key)
    input1 = jax.random.normal(k1, (B, P, E), dtype=jnp.float32)
    input2 = jax.random.normal(k2, (B, P, E), dtype=jnp.float32)
    gamma = 1.0 + 0.01 * jnp.arange(E, dtype=jnp.float32)
    beta = 0.05 * jnp.arange(E, dtype=jnp.float32)

    out = add_and_normalize(input1, input2, gamma, beta, **kwargs)
    out = jax.block_until_ready(out)

    ref = _reference(input1, input2, gamma, beta)
    assert out.shape == (B, P, E)
    assert jnp.allclose(out, ref, atol=1e-4, rtol=1e-4), \
        f"mismatch vs reference for B={B} P={P} E={E} kwargs={kwargs}"


if __name__ == "__main__":
    # Module defaults (batch=2, problem=8, embedding=32): VMEM-resident path.
    _run_case(B=2, P=8, E=32, seed=0)
    # Force the two-call (stats + parallel normalize) path, even tiling.
    _run_case(B=4, P=64, E=32, seed=1, small_path_rows=0, tile_rows=16)
    # Force the two-call path with a ragged last tile (in-kernel masking).
    _run_case(B=4, P=64, E=32, seed=2, small_path_rows=0, tile_rows=24)
    # Feature-padding fallback (E neither divides 128 nor is a multiple).
    _run_case(B=2, P=8, E=48, seed=3)

    # TODO(synk): BatchNorm1d running_mean/running_var buffer updates are
    # stateful training bookkeeping that does not affect this forward output;
    # they are intentionally not emitted.
    print("KERNEL_OK")
</pallas_src>

<mosaic_0001>
module attributes {stable_mosaic.version = 11 : i64} {
  func.func @kernel(%arg0: i32, %arg1: memref<4x128xf32, #tpu.memory_space<vmem>>, %arg2: memref<4x128xf32, #tpu.memory_space<vmem>>, %arg3: memref<1x128xf32, #tpu.memory_space<vmem>>, %arg4: memref<1x128xf32, #tpu.memory_space<vmem>>, %arg5: memref<4x128xf32, #tpu.memory_space<vmem>>) attributes {dimension_semantics = [#tpu.dimension_semantics<arbitrary>], iteration_bounds = array<i64: 1>, scalar_prefetch = 0 : i64, scratch_operands = 0 : i64, tpu.core_type = #tpu.core_type<tc>, window_params = [{pipeline_mode = #tpu.pipeline_mode<synchronous>, transform_indices = @transform_0, window_bounds = array<i64: 4, 128>}, {pipeline_mode = #tpu.pipeline_mode<synchronous>, transform_indices = @transform_1, window_bounds = array<i64: 4, 128>}, {pipeline_mode = #tpu.pipeline_mode<synchronous>, transform_indices = @transform_2, window_bounds = array<i64: 1, 128>}, {pipeline_mode = #tpu.pipeline_mode<synchronous>, transform_indices = @transform_3, window_bounds = array<i64: 1, 128>}, {pipeline_mode = #tpu.pipeline_mode<synchronous>, transform_indices = @transform_4, window_bounds = array<i64: 4, 128>}]} {
    %c0 = arith.constant 0 : index
    %c0_0 = arith.constant 0 : index
    %0 = vector.load %arg1[%c0, %c0_0] : memref<4x128xf32, #tpu.memory_space<vmem>>, vector<4x128xf32>
    %c0_1 = arith.constant 0 : index
    %c0_2 = arith.constant 0 : index
    %1 = vector.load %arg2[%c0_1, %c0_2] : memref<4x128xf32, #tpu.memory_space<vmem>>, vector<4x128xf32>
    %2 = arith.addf %0, %1 : vector<4x128xf32>
    %cst = arith.constant dense<0.000000e+00> : vector<128xf32>
    %3 = vector.multi_reduction <add>, %2, %cst [0] : vector<4x128xf32> to vector<128xf32>
    %4 = vector.shape_cast %3 : vector<128xf32> to vector<1x128xf32>
    %5 = arith.mulf %2, %2 : vector<4x128xf32>
    %cst_3 = arith.constant dense<0.000000e+00> : vector<128xf32>
    %6 = vector.multi_reduction <add>, %5, %cst_3 [0] : vector<4x128xf32> to vector<128xf32>
    %7 = vector.shape_cast %6 : vector<128xf32> to vector<1x128xf32>
    %c0_4 = arith.constant 0 : index
    %c0_5 = arith.constant 0 : index
    %8 = vector.load %arg3[%c0_4, %c0_5] : memref<1x128xf32, #tpu.memory_space<vmem>>, vector<1x128xf32>
    %c0_6 = arith.constant 0 : index
    %c0_7 = arith.constant 0 : index
    %9 = vector.load %arg4[%c0_6, %c0_7] : memref<1x128xf32, #tpu.memory_space<vmem>>, vector<1x128xf32>
    %c32_i32 = arith.constant 32 : i32
    %10 = tpu.dynamic_rotate %4 by %c32_i32 dim 1 : vector<1x128xf32>, i32 -> vector<1x128xf32>
    %11 = arith.addf %4, %10 : vector<1x128xf32>
    %c32_i32_8 = arith.constant 32 : i32
    %12 = tpu.dynamic_rotate %7 by %c32_i32_8 dim 1 : vector<1x128xf32>, i32 -> vector<1x128xf32>
    %13 = arith.addf %7, %12 : vector<1x128xf32>
    %c64_i32 = arith.constant 64 : i32
    %14 = tpu.dynamic_rotate %4 by %c64_i32 dim 1 : vector<1x128xf32>, i32 -> vector<1x128xf32>
    %15 = arith.addf %11, %14 : vector<1x128xf32>
    %c64_i32_9 = arith.constant 64 : i32
    %16 = tpu.dynamic_rotate %7 by %c64_i32_9 dim 1 : vector<1x128xf32>, i32 -> vector<1x128xf32>
    %17 = arith.addf %13, %16 : vector<1x128xf32>
    %c96_i32 = arith.constant 96 : i32
    %18 = tpu.dynamic_rotate %4 by %c96_i32 dim 1 : vector<1x128xf32>, i32 -> vector<1x128xf32>
    %19 = arith.addf %15, %18 : vector<1x128xf32>
    %c96_i32_10 = arith.constant 96 : i32
    %20 = tpu.dynamic_rotate %7 by %c96_i32_10 dim 1 : vector<1x128xf32>, i32 -> vector<1x128xf32>
    %21 = arith.addf %17, %20 : vector<1x128xf32>
    %cst_11 = arith.constant 6.250000e-02 : f32
    %22 = vector.broadcast %cst_11 : f32 to vector<1x128xf32>
    %23 = arith.mulf %19, %22 : vector<1x128xf32>
    %cst_12 = arith.constant 6.250000e-02 : f32
    %24 = vector.broadcast %cst_12 : f32 to vector<1x128xf32>
    %25 = arith.mulf %21, %24 : vector<1x128xf32>
    %26 = arith.mulf %23, %23 : vector<1x128xf32>
    %27 = arith.subf %25, %26 : vector<1x128xf32>
    %cst_13 = arith.constant 0.000000e+00 : f32
    %28 = vector.broadcast %cst_13 : f32 to vector<1x128xf32>
    %29 = arith.maximumf %27, %28 : vector<1x128xf32>
    %cst_14 = arith.constant 9.99999974E-6 : f32
    %30 = vector.broadcast %cst_14 : f32 to vector<1x128xf32>
    %31 = arith.addf %29, %30 : vector<1x128xf32>
    %32 = math.rsqrt %31 : vector<1x128xf32>
    %33 = arith.mulf %8, %32 : vector<1x128xf32>
    %34 = arith.mulf %23, %33 : vector<1x128xf32>
    %35 = arith.subf %9, %34 : vector<1x128xf32>
    %36 = vector.broadcast %33 : vector<1x128xf32> to vector<4x128xf32>
    %37 = arith.mulf %2, %36 : vector<4x128xf32>
    %38 = vector.broadcast %35 : vector<1x128xf32> to vector<4x128xf32>
    %39 = arith.addf %37, %38 : vector<4x128xf32>
    %c0_15 = arith.constant 0 : index
    %c0_16 = arith.constant 0 : index
    %40 = vector.load %arg5[%c0_15, %c0_16] : memref<4x128xf32, #tpu.memory_space<vmem>>, vector<4x128xf32>
    tpu.vector_store %arg5[%c0_15, %c0_16], %39 {strides = array<i32>} : memref<4x128xf32, #tpu.memory_space<vmem>>, vector<4x128xf32>,
    return
  }
  func.func @transform_0(%arg0: i32) -> (i32, i32) {
    %c0_i32 = arith.constant 0 : i32
    %c0_i32_0 = arith.constant 0 : i32
    %c0_i32_1 = arith.constant 0 : i32
    return %c0_i32, %c0_i32_0 : i32, i32
  }
  func.func @transform_1(%arg0: i32) -> (i32, i32) {
    %c0_i32 = arith.constant 0 : i32
    %c0_i32_0 = arith.constant 0 : i32
    %c0_i32_1 = arith.constant 0 : i32
    return %c0_i32, %c0_i32_0 : i32, i32
  }
  func.func @transform_2(%arg0: i32) -> (i32, i32) {
    %c0_i32 = arith.constant 0 : i32
    %c0_i32_0 = arith.constant 0 : i32
    %c0_i32_1 = arith.constant 0 : i32
    return %c0_i32, %c0_i32_0 : i32, i32
  }
  func.func @transform_3(%arg0: i32) -> (i32, i32) {
    %c0_i32 = arith.constant 0 : i32
    %c0_i32_0 = arith.constant 0 : i32
    %c0_i32_1 = arith.constant 0 : i32
    return %c0_i32, %c0_i32_0 : i32, i32
  }
  func.func @transform_4(%arg0: i32) -> (i32, i32) {
    %c0_i32 = arith.constant 0 : i32
    %c0_i32_0 = arith.constant 0 : i32
    %c0_i32_1 = arith.constant 0 : i32
    return %c0_i32, %c0_i32_0 : i32, i32
  }
}

</mosaic_0001>

<bundles_post_ra>
// kernel: tpu_custom_call.1
= control target key start
LH: loop header
LB: loop body
LE: loop exit
PB: predicated region body
PF: predicated region fallthrough
CT: control target
= control target key end

     0   :  { %9 = vsyncpa [#allocation3], 0  ;;  %s275_s0 = inlined_call_operand.hbm [shape: f32[4,128], index: 0, kind: input, shape index: {}]   ;;  %s276_s1 = inlined_call_operand.hbm [shape: f32[4,128], index: 1, kind: input, shape index: {}]   ;;  %s277_s2 = inlined_call_operand.vmem [shape: f32[1,128], index: 2, kind: input, shape index: {}]   ;;  %s278_s3 = inlined_call_operand.vmem [shape: f32[1,128], index: 3, kind: input, shape index: {}]   ;;  %s279_s4 = inlined_call_operand.hbm [shape: f32[4,128], index: 4, kind: output, shape index: {}]  }
   0x1   :  { %10 = vsyncpa [#allocation6], 0 }
   0x2   :  { %11 = vsyncpa [#allocation4], 0  ;;  %s202_s15 = smov [#allocation2]   ;;  %s203_s17 = smov [#allocation5]  }
   0x3   :  { %s18_s16 = sshll.u32 %s202_s15, 4  ;;  %s28_s18 = sshll.u32 %s203_s17, 4  ;;  %s19_s16 = int_to_ptr.vmem [resolvable:$true] %s18_s16  ;;  %s29_s18 = int_to_ptr.vmem [resolvable:$true] %s28_s18 }
   0x4   :  { %s130_s21 = scalar_lea.hbm %s275_s0, 64 }
   0x5   :  { %p131_p0 = scmp.ne.s32.totalorder %s275_s0, %s130_s21  ;;  %p134_p1 = scmp.lt.u32.totalorder %s130_s21, %s275_s0 }
   0x7   :  { %p136_p2 = pnand %p134_p1, %p131_p0 }
   0x9   :  { %139 = shalt.err (!%p136_p2)
}
   0xa   :  { %s140_s26 = scalar_lea.vmem %s19_s16, 64  ;;  %p145_p4 = scmp.lt.s32.totalorder %s19_s16, %s19_s16 }
   0xb   :  { %p141_p3 = scmp.ne.s32.totalorder %s19_s16, %s140_s26  ;;  %p146_p5 = scmp.lt.s32.totalorder %s140_s26, %s140_s26 }
   0xd   :  { %p147_p6 = por %p146_p5, %p145_p4 }
   0xf   :  { %p148_p7 = pnand %p147_p6, %p141_p3 }
  0x11   :  { %151 = shalt.err (!%p148_p7)
}
  0x12   :  { %21 = dma.hbm_to_vmem [thread:$0]  %s275_s0, 64, %s19_s16, [#allocation3]  }
  0x13   :  { %s152_s5 = scalar_lea.hbm %s276_s1, 64 }
  0x14   :  { %p153_p8 = scmp.ne.s32.totalorder %s276_s1, %s152_s5  ;;  %p156_p9 = scmp.lt.u32.totalorder %s152_s5, %s276_s1 }
  0x16   :  { %p158_p10 = pnand %p156_p9, %p153_p8 }
  0x18   :  { %161 = shalt.err (!%p158_p10)
}
  0x19   :  { %s162_s10 = scalar_lea.vmem %s29_s18, 64  ;;  %p167_p12 = scmp.lt.s32.totalorder %s29_s18, %s29_s18 }
  0x1a   :  { %p163_p11 = scmp.ne.s32.totalorder %s29_s18, %s162_s10  ;;  %p168_p13 = scmp.lt.s32.totalorder %s162_s10, %s162_s10 }
  0x1c   :  { %p169_p0 = por %p168_p13, %p167_p12 }
  0x1e   :  { %p170_p1 = pnand %p169_p0, %p163_p11 }
  0x20   :  { %173 = shalt.err (!%p170_p1)
}
  0x21   :  { %31 = dma.hbm_to_vmem [thread:$0]  %s276_s1, 64, %s29_s18, [#allocation6]  }
  0x22   :  { %196 = dma.done.wait [#allocation3], 64  }
  0x23   :  { %197 = vsyncadd [#allocation3], 4294967232 }
  0x24   :  { %198 = dma.done.wait [#allocation6], 64  }
  0x25   :  { %199 = vsyncadd [#allocation6], 4294967232  ;;  %v42_v0 = vld [vmem:[#allocation2] sm:$0xf]  ;;  %v43_v1 = vld [vmem:[#allocation5] sm:$0xf]  ;;  %v92_v36 = vlaneseq }
  0x26   :  { %vm45_vm0 = vcmask 1043456   ;;  %v44_v2 = vadd.f32 %v43_v1, %v42_v0  ;;  %s204_s1 = smov 64   ;;  %s205_s12 = smov 32   ;;  %v61_v38 = vld [vmem:[%s277_s2] sm:$0x1] }
  0x27   :  { %s206_s13 = smov 96   ;;  %v93_v37 = vshrl.u32 %v92_v36, 7  ;;  %v62_v42 = vld [vmem:[%s278_s3] sm:$0x1]  ;;  %s207_s18 = smov [#allocation7]  }
  0x28   :  { %v46_v3 = vsel %vm45_vm0, %v44_v2, 0.0  ;;  %v53_v4 = vmul.f32 %v44_v2, %v44_v2  ;;  %s112_s19 = sshll.u32 %s207_s18, 4  ;;  %s113_s19 = int_to_ptr.vmem [resolvable:$true] %s112_s19 }
  0x29   :  { %v47_v5 = vrot.slane %v46_v3, 4  ;;  %v94_v39 = vsub.s32 0, %v93_v37  ;;  %s174_s20 = scalar_lea.vmem %s113_s19, 64  ;;  %p179_p3 = scmp.lt.s32.totalorder %s113_s19, %s113_s19 }
  0x2a   :  { %v54_v6 = vsel %vm45_vm0, %v53_v4, 0.0  ;;  %p175_p2 = scmp.ne.s32.totalorder %s113_s19, %s174_s20  ;;  %p180_p4 = scmp.lt.s32.totalorder %s174_s20, %s174_s20 }
  0x2b   :  { %v48_v7 = vadd.f32 %v47_v5, %v46_v3  ;;  %v55_v8 = vrot.slane %v54_v6, 4 }
  0x2c   :  { %p181_p5 = por %p180_p4, %p179_p3 }
  0x2d   :  { %v49_v9 = vrot.slane %v48_v7, 2  ;;  %v56_v10 = vadd.f32 %v55_v8, %v54_v6 }
  0x2e   :  { %p182_p6 = pnand %p181_p5, %p175_p2 }
  0x2f   :  { %v50_v11 = vadd.f32 %v49_v9, %v48_v7  ;;  %v57_v12 = vrot.slane %v56_v10, 2 }
  0x31   :  { %v51_v13 = vrot.slane %v50_v11, 1  ;;  %v58_v14 = vadd.f32 %v57_v12, %v56_v10 }
  0x33   :  { %v52_v15 = vadd.f32 %v51_v13, %v50_v11  ;;  %v59_v16 = vrot.slane %v58_v14, 1 }
  0x35   :  { %69 = vrot.lane.b32.xlu1 %v52_v15, %s204_s1  ;;  %63 = vrot.lane.b32.xlu0 %v52_v15, %s205_s12  ;;  %v60_v17 = vadd.f32 %v59_v16, %v58_v14 }
  0x39   :  { %72 = vrot.lane.b32.xlu1 %v60_v17, %s204_s1  ;;  %66 = vrot.lane.b32.xlu0 %v60_v17, %s205_s12 }
  0x3d   :  { %78 = vrot.lane.b32.xlu1 %v60_v17, %s206_s13  ;;  %75 = vrot.lane.b32.xlu0 %v52_v15, %s206_s13 }
  0xa7   :  { %v70_v18 = vpop.permute.xlu1 %69  ;;  %v64_v19 = vpop.permute.xlu0 %63 }
  0xa8   :  { %v65_v20 = vadd.f32 %v64_v19, %v52_v15 }
  0xaa   :  { %v71_v25 = vadd.f32 %v70_v18, %v65_v20 }
  0xab   :  { %v73_v21 = vpop.permute.xlu1 %72  ;;  %v67_v22 = vpop.permute.xlu0 %66 }
  0xac   :  { %v68_v23 = vadd.f32 %v67_v22, %v60_v17 }
  0xae   :  { %v74_v24 = vadd.f32 %v73_v21, %v68_v23 }
  0xaf   :  { %v79_v26 = vpop.permute.xlu1 %78  ;;  %v76_v27 = vpop.permute.xlu0 %75 }
  0xb0   :  { %v80_v28 = vadd.f32 %v79_v26, %v74_v24  ;;  %v77_v29 = vadd.f32 %v76_v27, %v71_v25 }
  0xb2   :  { %v81_v30 = vmul.f32 0.0625, %v77_v29  ;;  %v82_v31 = vmul.f32 0.0625, %v80_v28 }
  0xb4   :  { %v83_v32 = vmul.f32 %v81_v30, %v81_v30 }
  0xb6   :  { %v84_v33 = vsub.f32 %v82_v31, %v83_v32 }
  0xb8   :  { %v85_v34 = vmax.f32 %v84_v33, 0.0 }
  0xba   :  { %v86_v35 = vadd.f32 1e-05, %v85_v34 }
  0xbc   :  { %128 = vrsqrt.f32 %v86_v35 }
  0xc6   :  { %v129_v40 = vpop.eup %128 }
  0xc7   :  { %v88_v41 = vmul.f32 %v129_v40, %v61_v38 }
  0xc9   :  { %v89_v43 = vmul.f32 %v88_v41, %v81_v30  ;;  %v95_v44 = vrot.slane %v88_v41, %v94_v39 }
  0xcb   :  { %v90_v45 = vsub.f32 %v62_v42, %v89_v43  ;;  %v97_v46 = vmul.f32 %v95_v44, %v44_v2 }
  0xcd   :  { %v102_v47 = vrot.slane %v90_v45, %v94_v39 }
  0xcf   :  { %v104_v48 = vadd.f32 %v102_v47, %v97_v46 }
  0xd1   :  { %105 = vst [vmem:[#allocation7] sm:$0xf] %v104_v48 }
  0xd2   :  { %185 = shalt.err (!%p182_p6)
}
  0xd3   :  { %s186_s3 = scalar_lea.hbm %s279_s4, 64 }
  0xd4   :  { %p187_p7 = scmp.ne.s32.totalorder %s279_s4, %s186_s3  ;;  %p190_p8 = scmp.lt.u32.totalorder %s186_s3, %s279_s4 }
  0xd6   :  { %p192_p9 = pnand %p190_p8, %p187_p7 }
  0xd8   :  { %195 = shalt.err (!%p192_p9)
}
  0xd9   :  { %115 = dma.vmem_to_hbm [thread:$0]  %s113_s19, 64, %s279_s4, [#allocation4]  }
  0xda   :  { %200 = dma.done.wait [#allocation4], 64  }
  0xdb   :  { %201 = vsyncadd [#allocation4], 4294967232 }
  0xdc   :  { %119 = vsyncpa [#allocation3], 1 }
  0xdd   :  { %120 = vsyncpa [#allocation6], 1 }
  0xde   :  { %121 = vsyncpa [#allocation4], 1 }

</bundles_post_ra>
